<compile_context>
chip_gen: v6e
topology: v6e:2x2x1
jax: 0.10.0
libtpu: 0.0.40
codegen_flags: <defaults>
</compile_context>

<pallas_src>
import math

import jax
import jax.numpy as jnp
from jax.experimental import pallas as pl
from jax.experimental.pallas import tpu as pltpu


def _round_up(x, m):
    return ((x + m - 1) // m) * m


def _mlp_kernel_dout1(xT_ref, w1T_ref, b1_ref, w2_ref, b2_ref, oT_ref):
    # xT_ref : (D_in, TM)  -- batch on the lane axis
    # w1T_ref: (H, D_in)
    # b1_ref : (H, 1)
    # w2_ref : (H, 1)      -- single output column
    # b2_ref : (1, 1)
    # oT_ref : (1, TM)     -- lane-dense output tile
    hT = jnp.dot(w1T_ref[...], xT_ref[...], preferred_element_type=jnp.float32)
    hT = jnp.maximum(hT + b1_ref[...], 0.0)                  # bias broadcasts over lanes
    # 32 -> 1 projection on the VPU (+ sublane reduce): frees the MXU and keeps
    # the store lane-dense instead of a masked 1-lane vst.
    yT = jnp.sum(hT * w2_ref[...], axis=0, keepdims=True)    # (1, TM)
    oT_ref[...] = (yT + b2_ref[...]).astype(oT_ref.dtype)


def _mlp_kernel_general(xT_ref, w1T_ref, b1_ref, w2T_ref, b2_ref, oT_ref):
    # Same as above but w2T_ref is (D_out, H) and the projection uses the MXU.
    hT = jnp.dot(w1T_ref[...], xT_ref[...], preferred_element_type=jnp.float32)
    hT = jnp.maximum(hT + b1_ref[...], 0.0)
    yT = jnp.dot(w2T_ref[...], hT, preferred_element_type=jnp.float32)
    oT_ref[...] = (yT + b2_ref[...]).astype(oT_ref.dtype)


def mlp_forward(x, w1, b1, w2, b2, *, tm=1024):
    """Fused MLP forward.

    x: [B, D_in], w1: [D_in, H], b1: [H], w2: [H, D_out], b2: [D_out]
    -> [B, D_out]  (same math as nn.Linear -> ReLU -> nn.Linear).
    """
    B, D_in = x.shape
    H = w1.shape[1]
    D_out = w2.shape[1]

    # Batch tile: multiple of 128 (lane width); don't over-pad tiny batches.
    tm_eff = min(tm, _round_up(B, 128))
    B_pad = _round_up(B, tm_eff)
    grid = (B_pad // tm_eff,)

    # One-time layout plumbing: put batch on the lane axis, pad the tail tile.
    xT = jnp.transpose(x)                                  # (D_in, B)
    if B_pad != B:
        xT = jnp.pad(xT, ((0, 0), (0, B_pad - B)))

    w1T = jnp.transpose(w1)                                # (H, D_in)
    b1c = b1.reshape(H, 1)
    b2c = b2.reshape(D_out, 1)

    if D_out == 1:
        kernel = _mlp_kernel_dout1
        w2_arg = w2.reshape(H, 1)
        w2_spec = pl.BlockSpec((H, 1), lambda i: (0, 0))
    else:
        kernel = _mlp_kernel_general
        w2_arg = jnp.transpose(w2)                         # (D_out, H)
        w2_spec = pl.BlockSpec((D_out, H), lambda i: (0, 0))

    # Derive a VMEM budget per call (double-buffered x/out tiles + resident
    # weights) with generous headroom, capped well under every generation's
    # physical VMEM (incl. v7x's 64 MiB).
    bytes_per_step = 4 * (2 * D_in * tm_eff + 2 * D_out * tm_eff
                          + H * D_in + H + H * D_out + D_out)
    vmem_limit = min(max(4 * bytes_per_step, 1 << 20), 32 << 20)

    oT = pl.pallas_call(
        kernel,
        out_shape=jax.ShapeDtypeStruct((D_out, B_pad), x.dtype),
        grid_spec=pl.GridSpec(
            grid=grid,
            in_specs=[
                pl.BlockSpec((D_in, tm_eff), lambda i: (0, i)),   # x tile (batch-tiled)
                pl.BlockSpec((H, D_in), lambda i: (0, 0)),        # w1T, VMEM-resident
                pl.BlockSpec((H, 1), lambda i: (0, 0)),           # b1,  VMEM-resident
                w2_spec,                                          # w2,  VMEM-resident
                pl.BlockSpec((D_out, 1), lambda i: (0, 0)),       # b2,  VMEM-resident
            ],
            out_specs=pl.BlockSpec((D_out, tm_eff), lambda i: (0, i)),
        ),
        compiler_params=pltpu.CompilerParams(
            dimension_semantics=("parallel",),   # shard batch tiles across TCs on v7x
            vmem_limit_bytes=vmem_limit,
        ),
    )(xT, w1T, b1c, w2_arg, b2c)

    return jnp.transpose(oT[:, :B])              # (B, D_out)


def init_mlp_params(key, input_dim, hidden_dim=32, output_dim=1):
    """Deterministic init mimicking PyTorch nn.Linear defaults."""
    k1, k2, k3, k4 = jax.random.split(key, 4)

    bound1 = 1.0 / math.sqrt(input_dim)
    w1 = jax.random.uniform(k1, (input_dim, hidden_dim),
                            minval=-bound1, maxval=bound1, dtype=jnp.float32)
    b1 = jax.random.uniform(k2, (hidden_dim,),
                            minval=-bound1, maxval=bound1, dtype=jnp.float32)

    bound2 = 1.0 / math.sqrt(hidden_dim)
    w2 = jax.random.uniform(k3, (hidden_dim, output_dim),
                            minval=-bound2, maxval=bound2, dtype=jnp.float32)
    b2 = jax.random.uniform(k4, (output_dim,),
                            minval=-bound2, maxval=bound2, dtype=jnp.float32)
    return w1, b1, w2, b2


if __name__ == "__main__":
    key = jax.random.PRNGKey(0)
    kx, kp, kp2 = jax.random.split(key, 3)

    # Small but tiling-exercising sizes: batch=200 with tm=128 -> 2 grid steps
    # (one padded tail tile); hidden=32, output_dim=1 per the module defaults.
    batch = 200
    input_dim = 16
    hidden_dim = 32
    output_dim = 1

    x = jax.random.normal(kx, (batch, input_dim), dtype=jnp.float32)
    w1, b1, w2, b2 = init_mlp_params(kp, input_dim, hidden_dim, output_dim)

    out = mlp_forward(x, w1, b1, w2, b2, tm=128)
    out = jax.block_until_ready(out)

    ref = jnp.maximum(x @ w1 + b1, 0.0) @ w2 + b2
    assert out.shape == (batch, output_dim)
    assert jnp.allclose(out, ref, atol=1e-5, rtol=1e-5)

    # Also exercise the general (D_out > 1) MXU path.
    w1g, b1g, w2g, b2g = init_mlp_params(kp2, input_dim, hidden_dim, 8)
    outg = jax.block_until_ready(mlp_forward(x, w1g, b1g, w2g, b2g, tm=128))
    refg = jnp.maximum(x @ w1g + b1g, 0.0) @ w2g + b2g
    assert outg.shape == (batch, 8)
    assert jnp.allclose(outg, refg, atol=1e-5, rtol=1e-5)

    print("KERNEL_OK")
</pallas_src>

<mosaic_0001>
module attributes {stable_mosaic.version = 11 : i64} {
  func.func @_mlp_kernel_dout1(%arg0: i32, %arg1: memref<16x128xf32, #tpu.memory_space<vmem>>, %arg2: memref<32x16xf32, #tpu.memory_space<vmem>>, %arg3: memref<32x1xf32, #tpu.memory_space<vmem>>, %arg4: memref<32x1xf32, #tpu.memory_space<vmem>>, %arg5: memref<1x1xf32, #tpu.memory_space<vmem>>, %arg6: memref<1x128xf32, #tpu.memory_space<vmem>>) attributes {dimension_semantics = [#tpu.dimension_semantics<parallel>], iteration_bounds = array<i64: 2>, scalar_prefetch = 0 : i64, scratch_operands = 0 : i64, tpu.core_type = #tpu.core_type<tc>, window_params = [{transform_indices = @transform_0, window_bounds = array<i64: 16, 128>}, {pipeline_mode = #tpu.pipeline_mode<synchronous>, transform_indices = @transform_1, window_bounds = array<i64: 32, 16>}, {pipeline_mode = #tpu.pipeline_mode<synchronous>, transform_indices = @transform_2, window_bounds = array<i64: 32, 1>}, {pipeline_mode = #tpu.pipeline_mode<synchronous>, transform_indices = @transform_3, window_bounds = array<i64: 32, 1>}, {pipeline_mode = #tpu.pipeline_mode<synchronous>, transform_indices = @transform_4, window_bounds = array<i64: 1, 1>}, {transform_indices = @transform_5, window_bounds = array<i64: 1, 128>}]} {
    %c0 = arith.constant 0 : index
    %c0_0 = arith.constant 0 : index
    %0 = vector.load %arg2[%c0, %c0_0] : memref<32x16xf32, #tpu.memory_space<vmem>>, vector<32x16xf32>
    %c0_1 = arith.constant 0 : index
    %c0_2 = arith.constant 0 : index
    %1 = vector.load %arg1[%c0_1, %c0_2] : memref<16x128xf32, #tpu.memory_space<vmem>>, vector<16x128xf32>
    %cst = arith.constant dense<0.000000e+00> : vector<32x128xf32>
    %2 = tpu.matmul %0, %1, %cst {dimension_numbers = #tpu.dot_dimension_numbers<[1], [0], [0], [1], [0, 0, 1, 1], [], []>} : vector<32x16xf32>, vector<16x128xf32>, vector<32x128xf32> -> vector<32x128xf32>
    %c0_3 = arith.constant 0 : index
    %c0_4 = arith.constant 0 : index
    %3 = vector.load %arg3[%c0_3, %c0_4] : memref<32x1xf32, #tpu.memory_space<vmem>>, vector<32x1xf32>
    %4 = vector.broadcast %3 : vector<32x1xf32> to vector<32x128xf32>
    %5 = arith.addf %2, %4 : vector<32x128xf32>
    %cst_5 = arith.constant 0.000000e+00 : f32
    %6 = vector.broadcast %cst_5 : f32 to vector<32x128xf32>
    %7 = arith.maximumf %5, %6 : vector<32x128xf32>
    %c0_6 = arith.constant 0 : index
    %c0_7 = arith.constant 0 : index
    %8 = vector.load %arg4[%c0_6, %c0_7] : memref<32x1xf32, #tpu.memory_space<vmem>>, vector<32x1xf32>
    %9 = vector.broadcast %8 : vector<32x1xf32> to vector<32x128xf32>
    %10 = arith.mulf %7, %9 : vector<32x128xf32>
    %cst_8 = arith.constant dense<0.000000e+00> : vector<128xf32>
    %11 = vector.multi_reduction <add>, %10, %cst_8 [0] : vector<32x128xf32> to vector<128xf32>
    %12 = vector.shape_cast %11 : vector<128xf32> to vector<1x128xf32>
    %c0_9 = arith.constant 0 : index
    %c0_10 = arith.constant 0 : index
    %13 = vector.load %arg5[%c0_9, %c0_10] : memref<1x1xf32, #tpu.memory_space<vmem>>, vector<1x1xf32>
    %14 = vector.broadcast %13 : vector<1x1xf32> to vector<1x128xf32>
    %15 = arith.addf %12, %14 : vector<1x128xf32>
    %c0_11 = arith.constant 0 : index
    %c0_12 = arith.constant 0 : index
    %16 = vector.load %arg6[%c0_11, %c0_12] : memref<1x128xf32, #tpu.memory_space<vmem>>, vector<1x128xf32>
    tpu.vector_store %arg6[%c0_11, %c0_12], %15 {strides = array<i32>} : memref<1x128xf32, #tpu.memory_space<vmem>>, vector<1x128xf32>,
    return
  }
  func.func @transform_0(%arg0: i32) -> (i32, i32) {
    %c0_i32 = arith.constant 0 : i32
    %c0_i32_0 = arith.constant 0 : i32
    return %c0_i32, %arg0 : i32, i32
  }
  func.func @transform_1(%arg0: i32) -> (i32, i32) {
    %c0_i32 = arith.constant 0 : i32
    %c0_i32_0 = arith.constant 0 : i32
    %c0_i32_1 = arith.constant 0 : i32
    return %c0_i32, %c0_i32_0 : i32, i32
  }
  func.func @transform_2(%arg0: i32) -> (i32, i32) {
    %c0_i32 = arith.constant 0 : i32
    %c0_i32_0 = arith.constant 0 : i32
    %c0_i32_1 = arith.constant 0 : i32
    return %c0_i32, %c0_i32_0 : i32, i32
  }
  func.func @transform_3(%arg0: i32) -> (i32, i32) {
    %c0_i32 = arith.constant 0 : i32
    %c0_i32_0 = arith.constant 0 : i32
    %c0_i32_1 = arith.constant 0 : i32
    return %c0_i32, %c0_i32_0 : i32, i32
  }
  func.func @transform_4(%arg0: i32) -> (i32, i32) {
    %c0_i32 = arith.constant 0 : i32
    %c0_i32_0 = arith.constant 0 : i32
    %c0_i32_1 = arith.constant 0 : i32
    return %c0_i32, %c0_i32_0 : i32, i32
  }
  func.func @transform_5(%arg0: i32) -> (i32, i32) {
    %c0_i32 = arith.constant 0 : i32
    %c0_i32_0 = arith.constant 0 : i32
    return %c0_i32, %arg0 : i32, i32
  }
}

</mosaic_0001>

<bundles_post_ra>
// kernel: tpu_custom_call.1
= control target key start
LH: loop header
LB: loop body
LE: loop exit
PB: predicated region body
PF: predicated region fallthrough
CT: control target
= control target key end

     0   :  { %s828_s0 = inlined_call_operand.vmem [shape: f32[16,256], index: 0, kind: input, shape index: {}]   ;;  %s829_s1 = inlined_call_operand.vmem [shape: f32[32,16], index: 1, kind: input, shape index: {}]   ;;  %s830_s2 = inlined_call_operand.vmem [shape: f32[32,1], index: 2, kind: input, shape index: {}]   ;;  %s831_s3 = inlined_call_operand.vmem [shape: f32[32,1], index: 3, kind: input, shape index: {}]   ;;  %s832_s4 = inlined_call_operand.<no memory space> [shape: f32[1,1], index: 4, kind: input, shape index: {}]   ;;  %s833_s5 = inlined_call_operand.hbm [shape: f32[1,256], index: 5, kind: output, shape index: {}]  }
   0x1   :  { %v10_v0 = vstv %s832_s4 }
   0x2   :  { %11 = vst [vmem:[#allocation2] sm:$0x1] %v10_v0 }
   0x3   :  { %12 = vsyncpa [#allocation5], 0 }
   0x4   :  { %14 = vsyncpa [#allocation5 + $0x1], 0  ;;  %s691_s20 = smov 0   ;;  %s693_s21 = smov 0  }
   0x5   :  { %s695_s22 = smov 0   ;;  %s697_s23 = smov 0  }
   0x6 LB: > { %s517_s4 = sadd.s32 4294967295, %s654_s23   ;;  %s518_s24 = sadd.s32 4294967294, %s654_s23   ;;  %s654_s23 = sphi %s697_s23, %s841_s23   ;;  %s650_s22 = sphi %s695_s22, %s840_s22   ;;  %s646_s21 = sphi %s693_s21, %s839_s21   ;;  %s642_s20 = sphi %s691_s20, %s838_s20  }
   0x7   : > { %s714_s25 = sadd.s32 1, %s654_s23   ;;  %s27_s26 = sadd.s32 1, %s650_s22 }
   0x8   : > { %s24_s27 = ssub.s32 %s654_s23, %s714_s25  ;;  %p34_p0 = scmp.ne.s32.totalorder %s650_s22, %s646_s21 }
   0x9   : > { %p25_p1 = scmp.eq.s32.totalorder %s24_s27, 0  ;;  %p35_p2 = scmp.eq.s32.totalorder %s654_s23, 0 }
   0xa   : > { %p148_p3 = scmp.eq.s32.totalorder %s517_s4, 1  ;;  %p153_p4 = scmp.ne.s32.totalorder %s646_s21, %s642_s20 }
   0xb   : > { %s727_s28 = scalar_select %p25_p1, %s650_s22, %s27_s26  }
   0xc   : > { %p36_p5 = por %p35_p2, %p34_p0  ;;  %p729_p6 = por %p148_p3, %p34_p0 }
   0xd   : > { %p154_p7 = scmp.eq.s32.totalorder %s518_s24, 1  ;;  %p834_p9 = scmp.ge.s32.totalorder %s654_s23, 2 }
   0xf   : > { %p733_p8 = por %p154_p7, %p153_p4  ;;  %182 = sbr.rel (%p834_p9) target bundleno = 25 (0x19), region = 32 }
  0x14   : > { %185 = sbr.rel (!%p36_p5) target bundleno = 25 (0x19), region = 36  ;;  %s187_s6 = sand.u32 (%p36_p5), 1, %s650_s22  }
  0x15   : > { %s522_s7 = sshll.u32 (%p36_p5), %s654_s23, 3  ;;  %s521_s8 = sshll.u32 (%p36_p5), %s187_s6, 4 }
  0x16   : > { %s191_s11 = scalar_lea.vmem (%p36_p5), %s828_s0, %s522_s7  ;;  %s189_s12 = scalar_lea.vmem (%p36_p5), [#allocation3], %s521_s8 }
  0x17   : > { %v222_v1 = vld [vmem:[%s191_s11] sm:$0xff] (%p36_p5)  ;;  %v224_v2 = vld [vmem:[%s191_s11 + $0x10] sm:$0xff] (%p36_p5) }
  0x18   : > { %223 = vst [vmem:[%s189_s12] sm:$0xff] (%p36_p5), %v222_v1  ;;  %225 = vst [vmem:[%s189_s12 + $0x8] sm:$0xff] (%p36_p5), %v224_v2 }
  0x19 PF: > { %p523_p10 = scmp.ge.s32.totalorder %s654_s23, 1  ;;  %p230_p11 = scmp.lt.s32.totalorder %s654_s23, 3 }
  0x1b   : > { %p231_p12 = pnand %p523_p10, %p230_p11 }
  0x1c   : > { %s748_s13 = sand.u32 (!%p231_p12), 1, %s646_s21   ;;  %s529_s7 = sshll.u32 (!%p231_p12), %s517_s4, 4 }
  0x1d   : > { %234 = sbr.rel (%p231_p12) target bundleno = 276 (0x114), region = 74  ;;  %s524_s18 = sshll.u32 (!%p231_p12), %s748_s13, 4 }
  0x1e   : > { %s239_s6 = scalar_lea.vmem (!%p231_p12), [#allocation3], %s524_s18  ;;  %s262_s8 = scalar_lea.vmem (!%p231_p12), [#allocation4], %s748_s13 }
  0x1f   : > { %s457_s9 = sshll.u32 (!%p231_p12), %s262_s8, 4  ;;  %s455_s12 = scalar_lea.hbm (!%p231_p12), %s833_s5, %s529_s7  ;;  %s458_s9 = int_to_ptr.vmem [resolvable:$true] %s457_s9 }
  0x20   : > { %s445_s14 = scalar_lea.sflag (!%p231_p12), [#allocation5], %s748_s13  ;;  %s594_s15 = scalar_lea.vmem (!%p231_p12), %s458_s9, 16 }
  0x21   : > { %p595_p13 = scmp.ne.s32.totalorder (!%p231_p12), %s458_s9, %s594_s15  ;;  %s657_s16 = smov (!%p231_p12), [#allocation4]  }
  0x22   : > { %v263_v3 = vld [vmem:[%s829_s1] sm:$0xff]  ;;  %vm293_vm0 = vcmask 130048   ;;  %v265_v4 = vld [vmem:[%s829_s1 + $0x10] sm:$0xff]  ;;  %v656_v6 = vmov 0   ;;  %v264_v10 = vld [vmem:[%s829_s1 + $0x8] sm:$0xff]  ;;  %v438_v45 = vlaneseq  ;;  %s598_s17 = sshll.u32 %s657_s16, 4  ;;  %s599_s17 = int_to_ptr.vmem [resolvable:$false] %s598_s17 }
  0x23   : > { %542 = vmatprep.mubr.msk.f32.mxu0 %vm293_vm0, %v263_v3  ;;  %545 = vmatprep.mubr.msk.f32.mxu1 %vm293_vm0, %v265_v4  ;;  %v269_v5 = vld [vmem:[%s830_s2] sm:$0xff]  ;;  %v271_v7 = vld [vmem:[%s830_s2 + $0x10] sm:$0xff]  ;;  %v266_v11 = vld [vmem:[%s829_s1 + $0x18] sm:$0xff]  ;;  %p596_p0 = pnand %p595_p13, %p729_p6  ;;  %s600_s4 = scalar_lea.vmem %s599_s17, 32 }
  0x24   : > { %592 = vset.pattern.permute.xlu0 %v656_v6  ;;  %593 = vset.pattern.permute.xlu1 %v656_v6  ;;  %v268_v8 = vld [vmem:[%s239_s6 + $0x8] sm:$0xff]  ;;  %v267_v9 = vld [vmem:[%s239_s6] sm:$0xff]  ;;  %v439_v48 = vshrl.u32 %v438_v45, 7  ;;  %p601_p2 = scmp.lt.s32.totalorder %s458_s9, %s599_s17  ;;  %p602_p3 = scmp.lt.s32.totalorder %s600_s4, %s594_s15 }
  0x25   : > { %275 = vperm.xlu0 %592, %v269_v5   ;;  %285 = vperm.xlu1 %593, %v271_v7   ;;  %v270_v12 = vld [vmem:[%s830_s2 + $0x8] sm:$0xff]  ;;  %v272_v13 = vld [vmem:[%s830_s2 + $0x18] sm:$0xff]  ;;  %v395_v14 = vld [vmem:[%s831_s3] sm:$0xff]  ;;  %p597_p1 = pneg %p596_p0 }
  0x26   : > { %538 = vmatprep.subr.mxu0 %v268_v8  ;;  %548 = vmatprep.subr.mxu1 %v268_v8  ;;  %v396_v15 = vld [vmem:[%s831_s3 + $0x8] sm:$0xff]  ;;  %v397_v16 = vld [vmem:[%s831_s3 + $0x10] sm:$0xff]  ;;  %v398_v17 = vld [vmem:[%s831_s3 + $0x18] sm:$0xff]  ;;  %v440_v51 = vsub.s32 0, %v439_v48  ;;  %p603_p4 = por %p602_p3, %p601_p2 }
  0x27   : > { %539 = vmatpush3.msra.mxu0 %v268_v8  ;;  %550 = vmatpush3.msra.mxu1 %v268_v8  ;;  %v432_v18 = vld [vmem:[#allocation2] sm:$0x1] }
  0x28   : > { %540 = vmatprep.subr.mxu0 %v267_v9  ;;  %549 = vmatprep.subr.mxu1 %v267_v9  ;;  %p604_p5 = pnand %p603_p4, %p597_p1 }
  0x29   : > { %541 = vmatpush3.msra.mxu0 %v267_v9  ;;  %551 = vmatpush3.msra.mxu1 %v267_v9 }
  0x2a   : > { %543 = vmatmul.mubr.msk.f32.vlgmr.msra.gmra.mxu0 %vm293_vm0, %v264_v10  ;;  %546 = vmatmul.mubr.msk.f32.vlgmr.msra.gmra.mxu1 %vm293_vm0, %v266_v11 }
  0x2b   : > { %280 = vperm.xlu0 %592, %v270_v12   ;;  %290 = vperm.xlu1 %593, %v272_v13  }
  0x2f   : > { %401 = vperm.xlu0 %592, %v395_v14   ;;  %406 = vperm.xlu1 %593, %v396_v15  }
  0x33   : > { %411 = vperm.xlu0 %592, %v397_v16   ;;  %416 = vperm.xlu1 %593, %v398_v17  }
  0x37   : > { %435 = vperm.xlu0 %592, %v432_v18  }
  0xa0   : > { %v276_v19 = vpop.permute.xlu0 %275  ;;  %v286_v20 = vpop.permute.xlu1 %285 }
  0xa6   : > { %v281_v21 = vpop.permute.xlu0 %280  ;;  %v291_v22 = vpop.permute.xlu1 %290 }
  0xaa   : > { %v402_v25 = vpop.permute.xlu0 %401  ;;  %v407_v33 = vpop.permute.xlu1 %406 }
  0xae   : > { %v412_v39 = vpop.permute.xlu0 %411  ;;  %v417_v42 = vpop.permute.xlu1 %416 }
  0xb2   : > { %v436_v53 = vpop.permute.xlu0 %435 }
  0xb3   : > { %v441_v55 = vrot.slane %v436_v53, %v440_v51 }
  0xea   : > { %v544_v23 = vpop.f32.mrf.mxu0  ;;  %v547_v24 = vpop.f32.mrf.mxu1 }
  0xeb   : > { %v378_v26 = vadd.f32 %v544_v23, %v281_v21  ;;  %v388_v30 = vadd.f32 %v547_v24, %v291_v22 }
  0xec   : > { %v372_v27 = vpop.f32.mrf.mxu0  ;;  %v382_v28 = vpop.f32.mrf.mxu1 }
  0xed   : > { %v392_v29 = vmax.f32 %v378_v26, 0.0  ;;  %v373_v31 = vadd.f32 %v372_v27, %v276_v19  ;;  %v383_v32 = vadd.f32 %v382_v28, %v286_v20  ;;  %v394_v37 = vmax.f32 %v388_v30, 0.0 }
  0xef   : > { %v391_v34 = vmax.f32 %v373_v31, 0.0  ;;  %v393_v35 = vmax.f32 %v383_v32, 0.0  ;;  %v420_v36 = vmul.f32 %v407_v33, %v392_v29  ;;  %v422_v43 = vmul.f32 %v417_v42, %v394_v37 }
  0xf1   : > { %v419_v38 = vmul.f32 %v402_v25, %v391_v34  ;;  %v421_v41 = vmul.f32 %v412_v39, %v393_v35 }
  0xf3   : > { %v423_v40 = vadd.f32 %v420_v36, %v419_v38 }
  0xf5   : > { %v424_v44 = vadd.f32 %v423_v40, %v421_v41 }
  0xf7   : > { %v425_v46 = vadd.f32 %v424_v44, %v422_v43 }
  0xf9   : > { %v426_v47 = vrot.slane %v425_v46, 4 }
  0xfb   : > { %v427_v49 = vadd.f32 %v426_v47, %v425_v46 }
  0xfd   : > { %v428_v50 = vrot.slane %v427_v49, 2 }
  0xff   : > { %v429_v52 = vadd.f32 %v428_v50, %v427_v49 }
 0x101   : > { %v430_v54 = vrot.slane %v429_v52, 1 }
 0x103   : > { %v431_v56 = vadd.f32 %v430_v54, %v429_v52 }
 0x105   : > { %v442_v57 = vadd.f32 %v441_v55, %v431_v56 }
 0x107   : > { %443 = vst [vmem:[%s262_s8] sm:$0x1] %v442_v57 }
 0x108   : > { %607 = shalt.err (!%p604_p5)
}
 0x109   : > { %s608_s18 = scalar_lea.hbm %s455_s12, 16  ;;  %s612_s24 = scalar_lea.hbm %s833_s5, 32 }
 0x10a   : > { %p609_p7 = scmp.ne.s32.totalorder %s455_s12, %s608_s18  ;;  %p613_p12 = scmp.lt.s32.totalorder %s455_s12, %s833_s5 }
 0x10b   : > { %p614_p13 = scmp.lt.s32.totalorder %s612_s24, %s608_s18 }
 0x10c   : > { %p610_p10 = pnand %p609_p7, %p729_p6 }
 0x10d   : > { %p615_p0 = por %p614_p13, %p613_p12 }
 0x10e   : > { %p611_p11 = pneg %p610_p10 }
 0x110   : > { %p616_p9 = pnand %p615_p0, %p611_p11 }
 0x112   : > { %619 = shalt.err (!%p616_p9)
}
 0x113   : > { %552 = dma.vmem_to_hbm [thread:$0]  (%p729_p6), %s458_s9, 16, %s455_s12, %s445_s14  }
 0x114 PF: > { %s469_s6 = sand.u32 1, %s642_s20   ;;  %p837_p1 = scmp.ge.s32.totalorder %s654_s23, 2 }
 0x115   : > { %s470_s7 = scalar_lea.sflag [#allocation5], %s469_s6 }
 0x116   : > { %p555_p2 = pnand %p837_p1, %p733_p8 }
 0x118   : > { %p556_p3 = pneg %p555_p2 }
 0x11a   : > { %637 = dma.done.wait (%p556_p3), %s470_s7, 16  }
 0x11b   : > { %639 = vsyncadd (%p556_p3), %s470_s7, 4294967280  ;;  %p17_p9 = scmp.ge.s32.totalorder %s714_s25, 4   ;;  %s838_s20 = smov %s646_s21 }
 0x11c   : > { %s839_s21 = smov %s650_s22  ;;  %s840_s22 = smov %s727_s28 }
 0x11d   : > { %s841_s23 = smov %s714_s25  ;;  %19 = sbr.rel (!%p17_p9) target bundleno = 6 (0x6), region = 118 }
 0x122   :  { %474 = vsyncpa [#allocation5], 1 }
 0x123   :  { %476 = vsyncpa [#allocation5 + $0x1], 1 }

</bundles_post_ra>
